<compile_context>
chip_gen: v7x
topology: tpu7x:2x2x1
jax: 0.10.0
libtpu: 0.0.40
codegen_flags: <defaults>
</compile_context>

<pallas_src>
import functools
import math

import jax
import jax.numpy as jnp
from jax.experimental import pallas as pl
from jax.experimental.pallas import tpu as pltpu


def _layer_norm(x, gamma, beta, eps=1e-5):
    # Matches LayerNormalization: biased variance over the last dim, f32 stats.
    mean = jnp.mean(x, axis=-1, keepdims=True)
    xc = x - mean
    var = jnp.mean(xc * xc, axis=-1, keepdims=True)
    return gamma * (xc * jax.lax.rsqrt(var + eps)) + beta


def encoder_stack_kernel(num_heads,
                         x_ref, wqkv_ref, wo_ref, w1_ref, w2_ref, pb_ref,
                         o_ref):
    Bb, S, D = x_ref.shape
    H = num_heads
    hd = D // H
    Hf = w1_ref.shape[-1]

    # Residual stream lives in the revisited output block (resident in VMEM
    # across the "arbitrary" layer axis). Initialize it from x at layer 0.
    @pl.when(pl.program_id(1) == 0)
    def _():
        o_ref[...] = x_ref[...]

    # Packed small per-layer parameters (one DMA instead of eight).
    pb = pb_ref[0]                       # (8, Pmax) f32
    bqkv = pb[0:1, :3 * D]               # Q-part already scaled by 1/sqrt(hd)
    bo = pb[1:2, :D]
    g1 = pb[2:3, :D]
    be1 = pb[3:4, :D]
    b1 = pb[4:5, :Hf]
    b2 = pb[5:6, :D]
    g2 = pb[6:7, :D]
    be2 = pb[7:8, :D]

    xm = o_ref[...].reshape(Bb * S, D).astype(jnp.float32)   # f32 residual
    xm_bf = xm.astype(jnp.bfloat16)

    # ---------------- multi-head self-attention (mask=None) ----------------
    # Fused QKV projection: bf16 operands, f32 accumulation. wqkv columns are
    # host-permuted to [Q(all heads) | K | V] (head-major inside each block)
    # and the Q columns carry the 1/sqrt(hd) softmax scale.
    qkv = jnp.dot(xm_bf, wqkv_ref[0],
                  preferred_element_type=jnp.float32) + bqkv   # (Bb*S, 3D)
    qkv = qkv.reshape(Bb, S, 3 * D)

    def heads(t):  # (Bb, S, D) head-major -> (H*Bb, S, hd)
        return jnp.concatenate(
            [t[:, :, h * hd:(h + 1) * hd] for h in range(H)], axis=0)

    qh = heads(qkv[:, :, 0:D]).astype(jnp.bfloat16)
    kh = heads(qkv[:, :, D:2 * D]).astype(jnp.bfloat16)
    vh = heads(qkv[:, :, 2 * D:3 * D]).astype(jnp.bfloat16)

    # One batched contraction over all (head, batch) pairs (leading batch dim
    # only -> safe MXU lowering); contracts the last dims directly (no k.T).
    scores = jnp.einsum("bqd,bkd->bqk", qh, kh,
                        preferred_element_type=jnp.float32)    # (H*Bb, S, S)
    scores = scores - jnp.max(scores, axis=-1, keepdims=True)
    p = jnp.exp(scores)
    p = p * pl.reciprocal(jnp.sum(p, axis=-1, keepdims=True), approx=True)
    ctx = jnp.einsum("bqk,bkd->bqd", p.astype(jnp.bfloat16), vh,
                     preferred_element_type=jnp.float32)       # (H*Bb, S, hd)
    ctx = ctx.astype(jnp.bfloat16)

    # Output projection as per-head accumulation: sum_h ctx_h @ Wo[h].
    # All indexing is on leading (free) axes -> no masked partial stores and
    # no (Bb*S, D) scratch buffer.
    attn_out = jnp.zeros((Bb * S, D), jnp.float32)
    for h in range(H):
        ctx_h = ctx[h * Bb:(h + 1) * Bb].reshape(Bb * S, hd)
        attn_out = attn_out + jnp.dot(ctx_h, wo_ref[0, h],
                                      preferred_element_type=jnp.float32)
    attn_out = attn_out + bo

    # dropout1: identity at inference
    x1 = _layer_norm(attn_out + xm, g1, be1)

    # ---------------- position-wise feed-forward ----------------
    h1 = jnp.dot(x1.astype(jnp.bfloat16), w1_ref[0],
                 preferred_element_type=jnp.float32) + b1
    h1 = jnp.maximum(h1, 0.0)                        # ReLU; dropout: identity
    ffn = jnp.dot(h1.astype(jnp.bfloat16), w2_ref[0],
                  preferred_element_type=jnp.float32) + b2

    # dropout2: identity at inference
    x2 = _layer_norm(ffn + x1, g2, be2)
    o_ref[...] = x2.reshape(Bb, S, D).astype(o_ref.dtype)


def encoder_forward(x, layer_params_list, num_heads, b_block=None):
    """Runs the whole layer stack in a single fused pallas_call."""
    B, S, D = x.shape
    Hf = layer_params_list[0]["w1"].shape[1]
    L = len(layer_params_list)
    H = num_heads
    hd = D // H

    # Batch-tile axis: gives v7x's two TensorCores independent work; on
    # single-TC chips it is a short sequential outer loop (set b_block=B there
    # to avoid re-fetching weights).
    if b_block is None:
        b_block = B // 2 if (B % 2 == 0 and B > 1) else B
    assert B % b_block == 0
    NB = B // b_block

    # Host-side column permutation (free): original layout groups columns per
    # head as [q_h | k_h | v_h]; permute to [Q(all heads) | K | V], head-major
    # inside each block, and fold the softmax scale into the Q columns/bias.
    perm = []
    for s in range(3):
        for h in range(H):
            base = h * 3 * hd + s * hd
            perm.extend(range(base, base + hd))
    perm = jnp.asarray(perm, dtype=jnp.int32)
    scale = 1.0 / math.sqrt(hd)
    qscale = jnp.concatenate([jnp.full((D,), scale, jnp.float32),
                              jnp.ones((2 * D,), jnp.float32)])

    def stack(name, fn=lambda a: a):
        return jnp.stack([fn(p[name]) for p in layer_params_list], axis=0)

    wqkv = stack("wqkv", lambda w: (w[:, perm] * qscale).astype(jnp.bfloat16))  # (L,D,3D)
    wo = stack("wo", lambda w: w.reshape(H, hd, D).astype(jnp.bfloat16))        # (L,H,hd,D)
    w1 = stack("w1", lambda w: w.astype(jnp.bfloat16))                          # (L,D,Hf)
    w2 = stack("w2", lambda w: w.astype(jnp.bfloat16))                          # (L,Hf,D)

    # Pack the eight tiny per-layer vectors into one (L, 8, Pmax) f32 tensor.
    Pmax = max(3 * D, Hf)

    def pad(v):
        v = v.reshape(-1)
        return jnp.pad(v, (0, Pmax - v.shape[0]))

    def pack(p):
        bqkv_p = p["bqkv"].reshape(-1)[perm] * qscale
        rows = [bqkv_p, p["bo"], p["gamma1"], p["beta1"],
                p["b1"], p["b2"], p["gamma2"], p["beta2"]]
        return jnp.stack([pad(r) for r in rows], axis=0)

    pbias = jnp.stack([pack(p) for p in layer_params_list], axis=0)  # (L,8,Pmax)

    def wspec(shape):  # per-layer weight block, selected by the layer index
        zeros = (0,) * len(shape)
        return pl.BlockSpec((1,) + shape, lambda b, l, _z=zeros: (l,) + _z)

    x_spec = pl.BlockSpec((b_block, S, D), lambda b, l: (b, 0, 0))

    # vmem limit derived per generation (v5e/v6e: 128 MiB phys, v7x: 64 MiB).
    try:
        vmem_cap = int(pltpu.get_tpu_info().vmem_capacity_bytes)
    except Exception:
        vmem_cap = 64 * 1024 * 1024
    vmem_limit = max(32 * 1024 * 1024,
                     min((vmem_cap * 3) // 4, 112 * 1024 * 1024))

    kernel = functools.partial(encoder_stack_kernel, num_heads)
    return pl.pallas_call(
        kernel,
        out_shape=jax.ShapeDtypeStruct((B, S, D), x.dtype),
        grid_spec=pltpu.PrefetchScalarGridSpec(
            num_scalar_prefetch=0,
            grid=(NB, L),
            in_specs=[
                x_spec,
                wspec((D, 3 * D)),      # Wqkv (permuted, Q pre-scaled)
                wspec((H, hd, D)),      # Wo reshaped per head
                wspec((D, Hf)),         # W1
                wspec((Hf, D)),         # W2
                wspec((8, Pmax)),       # packed biases / LN params
            ],
            out_specs=x_spec,           # revisited -> residual stream in VMEM
        ),
        compiler_params=pltpu.CompilerParams(
            dimension_semantics=("parallel", "arbitrary"),
            vmem_limit_bytes=vmem_limit,
        ),
    )(x, wqkv, wo, w1, w2, pbias)


# ---------------- deterministic parameter init (nn.Linear-style uniform) ----
def init_layer_params(key, d_model, ffn_hidden):
    def lin(k, fan_in, fan_out):
        bound = 1.0 / math.sqrt(fan_in)
        kw, kb = jax.random.split(k)
        w = jax.random.uniform(kw, (fan_in, fan_out), jnp.float32, -bound, bound)
        b = jax.random.uniform(kb, (1, fan_out), jnp.float32, -bound, bound)
        return w, b

    keys = jax.random.split(key, 4)
    wqkv, bqkv = lin(keys[0], d_model, 3 * d_model)
    wo, bo = lin(keys[1], d_model, d_model)
    w1, b1 = lin(keys[2], d_model, ffn_hidden)
    w2, b2 = lin(keys[3], ffn_hidden, d_model)
    ones = jnp.ones((1, d_model), jnp.float32)
    zeros = jnp.zeros((1, d_model), jnp.float32)
    return dict(wqkv=wqkv, bqkv=bqkv, wo=wo, bo=bo,
                gamma1=ones, beta1=zeros,
                w1=w1, b1=b1, w2=w2, b2=b2,
                gamma2=ones, beta2=zeros)


# ---------------- pure-JAX reference for a correctness check ----------------
def encoder_layer_ref(x, p, num_heads):
    B, S, D = x.shape
    hd = D // num_heads
    qkv = x @ p["wqkv"] + p["bqkv"][0]                     # (B, S, 3D)
    qkv = qkv.reshape(B, S, num_heads, 3 * hd).transpose(0, 2, 1, 3)
    q, k, v = qkv[..., :hd], qkv[..., hd:2 * hd], qkv[..., 2 * hd:]
    s = jnp.einsum("bhqd,bhkd->bhqk", q, k) / math.sqrt(hd)
    a = jax.nn.softmax(s, axis=-1)
    vals = jnp.einsum("bhqk,bhkd->bhqd", a, v)
    vals = vals.transpose(0, 2, 1, 3).reshape(B, S, D)
    attn_out = vals @ p["wo"] + p["bo"][0]

    def ln(z, g, b):
        m = z.mean(-1, keepdims=True)
        var = ((z - m) ** 2).mean(-1, keepdims=True)
        return g[0] * (z - m) / jnp.sqrt(var + 1e-5) + b[0]

    x1 = ln(attn_out + x, p["gamma1"], p["beta1"])
    h = jnp.maximum(x1 @ p["w1"] + p["b1"][0], 0.0)
    x2 = ln(h @ p["w2"] + p["b2"][0] + x1, p["gamma2"], p["beta2"])
    return x2


if __name__ == "__main__":
    d_model, ffn_hidden, num_heads, num_layers = 32, 64, 4, 2
    B, S = 2, 8

    root = jax.random.PRNGKey(0)
    kx, kp = jax.random.split(root)
    x = jax.random.normal(kx, (B, S, d_model), jnp.float32)

    layer_keys = jax.random.split(kp, num_layers)
    layer_params = [init_layer_params(k, d_model, ffn_hidden) for k in layer_keys]

    out = encoder_forward(x, layer_params, num_heads)
    out = jax.block_until_ready(out)

    # Reference in f32 using bf16-rounded matmul weights; remaining divergence
    # is the kernel's bf16 matmul operands / scale folding / approx reciprocal.
    ref = x
    for p in layer_params:
        pr = dict(p)
        for name in ("wqkv", "wo", "w1", "w2"):
            pr[name] = p[name].astype(jnp.bfloat16).astype(jnp.float32)
        ref = encoder_layer_ref(ref, pr, num_heads)

    assert out.shape == (B, S, d_model)
    max_err = float(jnp.max(jnp.abs(out - ref)))
    assert jnp.allclose(out, ref, atol=5e-2, rtol=5e-2), max_err

    print("KERNEL_OK")
</pallas_src>

<mosaic_0001>
module attributes {stable_mosaic.version = 11 : i64} {
  func.func @encoder_stack_kernel(%arg0: i32, %arg1: i32, %arg2: memref<1x8x32xf32, #tpu.memory_space<vmem>>, %arg3: memref<1x32x96xbf16, #tpu.memory_space<vmem>>, %arg4: memref<1x4x8x32xbf16, #tpu.memory_space<vmem>>, %arg5: memref<1x32x64xbf16, #tpu.memory_space<vmem>>, %arg6: memref<1x64x32xbf16, #tpu.memory_space<vmem>>, %arg7: memref<1x8x96xf32, #tpu.memory_space<vmem>>, %arg8: memref<1x8x32xf32, #tpu.memory_space<vmem>>) attributes {dimension_semantics = [#tpu.dimension_semantics<parallel>, #tpu.dimension_semantics<arbitrary>], iteration_bounds = array<i64: 2, 2>, scalar_prefetch = 0 : i64, scratch_operands = 0 : i64, tpu.core_type = #tpu.core_type<tc>, window_params = [{transform_indices = @transform_0, window_bounds = array<i64: 1, 8, 32>}, {transform_indices = @transform_1, window_bounds = array<i64: 1, 32, 96>}, {transform_indices = @transform_2, window_bounds = array<i64: 1, 4, 8, 32>}, {transform_indices = @transform_3, window_bounds = array<i64: 1, 32, 64>}, {transform_indices = @transform_4, window_bounds = array<i64: 1, 64, 32>}, {transform_indices = @transform_5, window_bounds = array<i64: 1, 8, 96>}, {transform_indices = @transform_6, window_bounds = array<i64: 1, 8, 32>}]} {
    %c0_i32 = arith.constant 0 : i32
    %0 = arith.cmpi eq, %arg1, %c0_i32 : i32
    %1 = arith.extui %0 : i1 to i32
    %c0_i32_0 = arith.constant 0 : i32
    %2 = arith.cmpi ne, %1, %c0_i32_0 : i32
    scf.if %2 {
      %c0_53 = arith.constant 0 : index
      %c0_54 = arith.constant 0 : index
      %c0_55 = arith.constant 0 : index
      %142 = vector.load %arg2[%c0_53, %c0_54, %c0_55] : memref<1x8x32xf32, #tpu.memory_space<vmem>>, vector<1x8x32xf32>
      %c0_56 = arith.constant 0 : index
      %c0_57 = arith.constant 0 : index
      %c0_58 = arith.constant 0 : index
      %143 = vector.load %arg8[%c0_56, %c0_57, %c0_58] : memref<1x8x32xf32, #tpu.memory_space<vmem>>, vector<1x8x32xf32>
      tpu.vector_store %arg8[%c0_56, %c0_57, %c0_58], %142 {strides = array<i32>} : memref<1x8x32xf32, #tpu.memory_space<vmem>>, vector<1x8x32xf32>,
    } else {
    }
    %c0 = arith.constant 0 : index
    %c0_1 = arith.constant 0 : index
    %c0_2 = arith.constant 0 : index
    %3 = vector.load %arg7[%c0, %c0_1, %c0_2] : memref<1x8x96xf32, #tpu.memory_space<vmem>>, vector<1x8x96xf32>
    %4 = vector.shape_cast %3 : vector<1x8x96xf32> to vector<8x96xf32>
    %5 = vector.extract_strided_slice %4 {offsets = [0, 0], sizes = [1, 96], strides = [1, 1]} : vector<8x96xf32> to vector<1x96xf32>
    %6 = vector.extract_strided_slice %4 {offsets = [1, 0], sizes = [1, 32], strides = [1, 1]} : vector<8x96xf32> to vector<1x32xf32>
    %7 = vector.extract_strided_slice %4 {offsets = [2, 0], sizes = [1, 32], strides = [1, 1]} : vector<8x96xf32> to vector<1x32xf32>
    %8 = vector.extract_strided_slice %4 {offsets = [3, 0], sizes = [1, 32], strides = [1, 1]} : vector<8x96xf32> to vector<1x32xf32>
    %9 = vector.extract_strided_slice %4 {offsets = [4, 0], sizes = [1, 64], strides = [1, 1]} : vector<8x96xf32> to vector<1x64xf32>
    %10 = vector.extract_strided_slice %4 {offsets = [5, 0], sizes = [1, 32], strides = [1, 1]} : vector<8x96xf32> to vector<1x32xf32>
    %11 = vector.extract_strided_slice %4 {offsets = [6, 0], sizes = [1, 32], strides = [1, 1]} : vector<8x96xf32> to vector<1x32xf32>
    %12 = vector.extract_strided_slice %4 {offsets = [7, 0], sizes = [1, 32], strides = [1, 1]} : vector<8x96xf32> to vector<1x32xf32>
    %c0_3 = arith.constant 0 : index
    %c0_4 = arith.constant 0 : index
    %c0_5 = arith.constant 0 : index
    %13 = vector.load %arg8[%c0_3, %c0_4, %c0_5] : memref<1x8x32xf32, #tpu.memory_space<vmem>>, vector<1x8x32xf32>
    %14 = vector.shape_cast %13 : vector<1x8x32xf32> to vector<8x32xf32>
    %15 = arith.truncf %14 : vector<8x32xf32> to vector<8x32xbf16>
    %c0_6 = arith.constant 0 : index
    %c0_7 = arith.constant 0 : index
    %c0_8 = arith.constant 0 : index
    %16 = vector.load %arg3[%c0_6, %c0_7, %c0_8] : memref<1x32x96xbf16, #tpu.memory_space<vmem>>, vector<1x32x96xbf16>
    %17 = vector.shape_cast %16 : vector<1x32x96xbf16> to vector<32x96xbf16>
    %cst = arith.constant dense<0.000000e+00> : vector<8x96xf32>
    %18 = tpu.matmul %15, %17, %cst {dimension_numbers = #tpu.dot_dimension_numbers<[1], [0], [0], [1], [0, 0, 1, 1], [], []>} : vector<8x32xbf16>, vector<32x96xbf16>, vector<8x96xf32> -> vector<8x96xf32>
    %19 = vector.broadcast %5 : vector<1x96xf32> to vector<8x96xf32>
    %20 = arith.addf %18, %19 : vector<8x96xf32>
    %21 = vector.shape_cast %20 : vector<8x96xf32> to vector<1x8x96xf32>
    %22 = vector.extract_strided_slice %21 {offsets = [0, 0, 0], sizes = [1, 8, 32], strides = [1, 1, 1]} : vector<1x8x96xf32> to vector<1x8x32xf32>
    %23 = vector.extract_strided_slice %22 {offsets = [0, 0, 0], sizes = [1, 8, 8], strides = [1, 1, 1]} : vector<1x8x32xf32> to vector<1x8x8xf32>
    %24 = vector.extract_strided_slice %22 {offsets = [0, 0, 8], sizes = [1, 8, 8], strides = [1, 1, 1]} : vector<1x8x32xf32> to vector<1x8x8xf32>
    %25 = vector.extract_strided_slice %22 {offsets = [0, 0, 16], sizes = [1, 8, 8], strides = [1, 1, 1]} : vector<1x8x32xf32> to vector<1x8x8xf32>
    %26 = vector.extract_strided_slice %22 {offsets = [0, 0, 24], sizes = [1, 8, 8], strides = [1, 1, 1]} : vector<1x8x32xf32> to vector<1x8x8xf32>
    %27 = tpu.concatenate %23, %24, %25, %26 in 0 : vector<1x8x8xf32>, vector<1x8x8xf32>, vector<1x8x8xf32>, vector<1x8x8xf32> -> vector<4x8x8xf32>
    %28 = arith.truncf %27 : vector<4x8x8xf32> to vector<4x8x8xbf16>
    %29 = vector.extract_strided_slice %21 {offsets = [0, 0, 32], sizes = [1, 8, 32], strides = [1, 1, 1]} : vector<1x8x96xf32> to vector<1x8x32xf32>
    %30 = vector.extract_strided_slice %29 {offsets = [0, 0, 0], sizes = [1, 8, 8], strides = [1, 1, 1]} : vector<1x8x32xf32> to vector<1x8x8xf32>
    %31 = vector.extract_strided_slice %29 {offsets = [0, 0, 8], sizes = [1, 8, 8], strides = [1, 1, 1]} : vector<1x8x32xf32> to vector<1x8x8xf32>
    %32 = vector.extract_strided_slice %29 {offsets = [0, 0, 16], sizes = [1, 8, 8], strides = [1, 1, 1]} : vector<1x8x32xf32> to vector<1x8x8xf32>
    %33 = vector.extract_strided_slice %29 {offsets = [0, 0, 24], sizes = [1, 8, 8], strides = [1, 1, 1]} : vector<1x8x32xf32> to vector<1x8x8xf32>
    %34 = tpu.concatenate %30, %31, %32, %33 in 0 : vector<1x8x8xf32>, vector<1x8x8xf32>, vector<1x8x8xf32>, vector<1x8x8xf32> -> vector<4x8x8xf32>
    %35 = arith.truncf %34 : vector<4x8x8xf32> to vector<4x8x8xbf16>
    %36 = vector.extract_strided_slice %21 {offsets = [0, 0, 64], sizes = [1, 8, 32], strides = [1, 1, 1]} : vector<1x8x96xf32> to vector<1x8x32xf32>
    %37 = vector.extract_strided_slice %36 {offsets = [0, 0, 0], sizes = [1, 8, 8], strides = [1, 1, 1]} : vector<1x8x32xf32> to vector<1x8x8xf32>
    %38 = vector.extract_strided_slice %36 {offsets = [0, 0, 8], sizes = [1, 8, 8], strides = [1, 1, 1]} : vector<1x8x32xf32> to vector<1x8x8xf32>
    %39 = vector.extract_strided_slice %36 {offsets = [0, 0, 16], sizes = [1, 8, 8], strides = [1, 1, 1]} : vector<1x8x32xf32> to vector<1x8x8xf32>
    %40 = vector.extract_strided_slice %36 {offsets = [0, 0, 24], sizes = [1, 8, 8], strides = [1, 1, 1]} : vector<1x8x32xf32> to vector<1x8x8xf32>
    %41 = tpu.concatenate %37, %38, %39, %40 in 0 : vector<1x8x8xf32>, vector<1x8x8xf32>, vector<1x8x8xf32>, vector<1x8x8xf32> -> vector<4x8x8xf32>
    %42 = arith.truncf %41 : vector<4x8x8xf32> to vector<4x8x8xbf16>
    "tpu.trace_start"() <{level = 10 : i32, message = "bqd,bkd->bqk"}> : () -> ()
    %cst_9 = arith.constant dense<0.000000e+00> : vector<4x8x8xf32>
    %43 = tpu.matmul %28, %35, %cst_9 {dimension_numbers = #tpu.dot_dimension_numbers<[2], [2], [1], [1], [0, 0, 0, 1, 1, 1], [0], [0]>} : vector<4x8x8xbf16>, vector<4x8x8xbf16>, vector<4x8x8xf32> -> vector<4x8x8xf32>
    "tpu.trace_stop"() : () -> ()
    %cst_10 = arith.constant dense<0xFF800000> : vector<4x8xf32>
    %44 = vector.multi_reduction <maximumf>, %43, %cst_10 [2] : vector<4x8x8xf32> to vector<4x8xf32>
    %45 = vector.shape_cast %44 : vector<4x8xf32> to vector<4x8x1xf32>
    %46 = vector.broadcast %45 : vector<4x8x1xf32> to vector<4x8x8xf32>
    %47 = arith.subf %43, %46 : vector<4x8x8xf32>
    %48 = math.exp %47 : vector<4x8x8xf32>
    %cst_11 = arith.constant dense<0.000000e+00> : vector<4x8xf32>
    %49 = vector.multi_reduction <add>, %48, %cst_11 [2] : vector<4x8x8xf32> to vector<4x8xf32>
    %50 = vector.shape_cast %49 : vector<4x8xf32> to vector<4x8x1xf32>
    %51 = tpu.reciprocal %50 {approx = true} : vector<4x8x1xf32> -> vector<4x8x1xf32>
    %52 = vector.broadcast %51 : vector<4x8x1xf32> to vector<4x8x8xf32>
    %53 = arith.mulf %48, %52 : vector<4x8x8xf32>
    %54 = arith.truncf %53 : vector<4x8x8xf32> to vector<4x8x8xbf16>
    "tpu.trace_start"() <{level = 10 : i32, message = "bqk,bkd->bqd"}> : () -> ()
    %cst_12 = arith.constant dense<0.000000e+00> : vector<4x8x8xf32>
    %55 = tpu.matmul %54, %42, %cst_12 {dimension_numbers = #tpu.dot_dimension_numbers<[2], [1], [1], [2], [0, 0, 0, 1, 1, 2], [0], [0]>} : vector<4x8x8xbf16>, vector<4x8x8xbf16>, vector<4x8x8xf32> -> vector<4x8x8xf32>
    "tpu.trace_stop"() : () -> ()
    %56 = arith.truncf %55 : vector<4x8x8xf32> to vector<4x8x8xbf16>
    %cst_13 = arith.constant 0.000000e+00 : f32
    %57 = vector.broadcast %cst_13 : f32 to vector<8x32xf32>
    %58 = vector.extract_strided_slice %56 {offsets = [0, 0, 0], sizes = [1, 8, 8], strides = [1, 1, 1]} : vector<4x8x8xbf16> to vector<1x8x8xbf16>
    %59 = vector.shape_cast %58 : vector<1x8x8xbf16> to vector<8x8xbf16>
    %c0_14 = arith.constant 0 : index
    %c0_15 = arith.constant 0 : index
    %c0_16 = arith.constant 0 : index
    %c0_17 = arith.constant 0 : index
    %60 = vector.load %arg4[%c0_14, %c0_15, %c0_16, %c0_17] : memref<1x4x8x32xbf16, #tpu.memory_space<vmem>>, vector<1x1x8x32xbf16>
    %61 = vector.shape_cast %60 : vector<1x1x8x32xbf16> to vector<8x32xbf16>
    %cst_18 = arith.constant dense<0.000000e+00> : vector<8x32xf32>
    %62 = tpu.matmul %59, %61, %cst_18 {dimension_numbers = #tpu.dot_dimension_numbers<[1], [0], [0], [1], [0, 0, 1, 1], [], []>} : vector<8x8xbf16>, vector<8x32xbf16>, vector<8x32xf32> -> vector<8x32xf32>
    %63 = arith.addf %57, %62 : vector<8x32xf32>
    %64 = vector.extract_strided_slice %56 {offsets = [1, 0, 0], sizes = [1, 8, 8], strides = [1, 1, 1]} : vector<4x8x8xbf16> to vector<1x8x8xbf16>
    %65 = vector.shape_cast %64 : vector<1x8x8xbf16> to vector<8x8xbf16>
    %c0_19 = arith.constant 0 : index
    %c1 = arith.constant 1 : index
    %c0_20 = arith.constant 0 : index
    %c0_21 = arith.constant 0 : index
    %66 = vector.load %arg4[%c0_19, %c1, %c0_20, %c0_21] : memref<1x4x8x32xbf16, #tpu.memory_space<vmem>>, vector<1x1x8x32xbf16>
    %67 = vector.shape_cast %66 : vector<1x1x8x32xbf16> to vector<8x32xbf16>
    %cst_22 = arith.constant dense<0.000000e+00> : vector<8x32xf32>
    %68 = tpu.matmul %65, %67, %cst_22 {dimension_numbers = #tpu.dot_dimension_numbers<[1], [0], [0], [1], [0, 0, 1, 1], [], []>} : vector<8x8xbf16>, vector<8x32xbf16>, vector<8x32xf32> -> vector<8x32xf32>
    %69 = arith.addf %63, %68 : vector<8x32xf32>
    %70 = vector.extract_strided_slice %56 {offsets = [2, 0, 0], sizes = [1, 8, 8], strides = [1, 1, 1]} : vector<4x8x8xbf16> to vector<1x8x8xbf16>
    %71 = vector.shape_cast %70 : vector<1x8x8xbf16> to vector<8x8xbf16>
    %c0_23 = arith.constant 0 : index
    %c2 = arith.constant 2 : index
    %c0_24 = arith.constant 0 : index
    %c0_25 = arith.constant 0 : index
    %72 = vector.load %arg4[%c0_23, %c2, %c0_24, %c0_25] : memref<1x4x8x32xbf16, #tpu.memory_space<vmem>>, vector<1x1x8x32xbf16>
    %73 = vector.shape_cast %72 : vector<1x1x8x32xbf16> to vector<8x32xbf16>
    %cst_26 = arith.constant dense<0.000000e+00> : vector<8x32xf32>
    %74 = tpu.matmul %71, %73, %cst_26 {dimension_numbers = #tpu.dot_dimension_numbers<[1], [0], [0], [1], [0, 0, 1, 1], [], []>} : vector<8x8xbf16>, vector<8x32xbf16>, vector<8x32xf32> -> vector<8x32xf32>
    %75 = arith.addf %69, %74 : vector<8x32xf32>
    %76 = vector.extract_strided_slice %56 {offsets = [3, 0, 0], sizes = [1, 8, 8], strides = [1, 1, 1]} : vector<4x8x8xbf16> to vector<1x8x8xbf16>
    %77 = vector.shape_cast %76 : vector<1x8x8xbf16> to vector<8x8xbf16>
    %c0_27 = arith.constant 0 : index
    %c3 = arith.constant 3 : index
    %c0_28 = arith.constant 0 : index
    %c0_29 = arith.constant 0 : index
    %78 = vector.load %arg4[%c0_27, %c3, %c0_28, %c0_29] : memref<1x4x8x32xbf16, #tpu.memory_space<vmem>>, vector<1x1x8x32xbf16>
    %79 = vector.shape_cast %78 : vector<1x1x8x32xbf16> to vector<8x32xbf16>
    %cst_30 = arith.constant dense<0.000000e+00> : vector<8x32xf32>
    %80 = tpu.matmul %77, %79, %cst_30 {dimension_numbers = #tpu.dot_dimension_numbers<[1], [0], [0], [1], [0, 0, 1, 1], [], []>} : vector<8x8xbf16>, vector<8x32xbf16>, vector<8x32xf32> -> vector<8x32xf32>
    %81 = arith.addf %75, %80 : vector<8x32xf32>
    %82 = vector.broadcast %6 : vector<1x32xf32> to vector<8x32xf32>
    %83 = arith.addf %81, %82 : vector<8x32xf32>
    %84 = arith.addf %83, %14 : vector<8x32xf32>
    %cst_31 = arith.constant dense<0.000000e+00> : vector<8xf32>
    %85 = vector.multi_reduction <add>, %84, %cst_31 [1] : vector<8x32xf32> to vector<8xf32>
    %86 = vector.shape_cast %85 : vector<8xf32> to vector<8x1xf32>
    %cst_32 = arith.constant 3.200000e+01 : f32
    %87 = vector.broadcast %cst_32 : f32 to vector<8x1xf32>
    %88 = arith.divf %86, %87 : vector<8x1xf32>
    %89 = vector.broadcast %88 : vector<8x1xf32> to vector<8x32xf32>
    %90 = arith.subf %84, %89 : vector<8x32xf32>
    %91 = arith.mulf %90, %90 : vector<8x32xf32>
    %cst_33 = arith.constant dense<0.000000e+00> : vector<8xf32>
    %92 = vector.multi_reduction <add>, %91, %cst_33 [1] : vector<8x32xf32> to vector<8xf32>
    %93 = vector.shape_cast %92 : vector<8xf32> to vector<8x1xf32>
    %cst_34 = arith.constant 3.200000e+01 : f32
    %94 = vector.broadcast %cst_34 : f32 to vector<8x1xf32>
    %95 = arith.divf %93, %94 : vector<8x1xf32>
    %cst_35 = arith.constant 9.99999974E-6 : f32
    %96 = vector.broadcast %cst_35 : f32 to vector<8x1xf32>
    %97 = arith.addf %95, %96 : vector<8x1xf32>
    %98 = math.rsqrt %97 : vector<8x1xf32>
    %99 = vector.broadcast %98 : vector<8x1xf32> to vector<8x32xf32>
    %100 = arith.mulf %90, %99 : vector<8x32xf32>
    %101 = vector.broadcast %7 : vector<1x32xf32> to vector<8x32xf32>
    %102 = arith.mulf %101, %100 : vector<8x32xf32>
    %103 = vector.broadcast %8 : vector<1x32xf32> to vector<8x32xf32>
    %104 = arith.addf %102, %103 : vector<8x32xf32>
    %105 = arith.truncf %104 : vector<8x32xf32> to vector<8x32xbf16>
    %c0_36 = arith.constant 0 : index
    %c0_37 = arith.constant 0 : index
    %c0_38 = arith.constant 0 : index
    %106 = vector.load %arg5[%c0_36, %c0_37, %c0_38] : memref<1x32x64xbf16, #tpu.memory_space<vmem>>, vector<1x32x64xbf16>
    %107 = vector.shape_cast %106 : vector<1x32x64xbf16> to vector<32x64xbf16>
    %cst_39 = arith.constant dense<0.000000e+00> : vector<8x64xf32>
    %108 = tpu.matmul %105, %107, %cst_39 {dimension_numbers = #tpu.dot_dimension_numbers<[1], [0], [0], [1], [0, 0, 1, 1], [], []>} : vector<8x32xbf16>, vector<32x64xbf16>, vector<8x64xf32> -> vector<8x64xf32>
    %109 = vector.broadcast %9 : vector<1x64xf32> to vector<8x64xf32>
    %110 = arith.addf %108, %109 : vector<8x64xf32>
    %cst_40 = arith.constant 0.000000e+00 : f32
    %111 = vector.broadcast %cst_40 : f32 to vector<8x64xf32>
    %112 = arith.maximumf %110, %111 : vector<8x64xf32>
    %113 = arith.truncf %112 : vector<8x64xf32> to vector<8x64xbf16>
    %c0_41 = arith.constant 0 : index
    %c0_42 = arith.constant 0 : index
    %c0_43 = arith.constant 0 : index
    %114 = vector.load %arg6[%c0_41, %c0_42, %c0_43] : memref<1x64x32xbf16, #tpu.memory_space<vmem>>, vector<1x64x32xbf16>
    %115 = vector.shape_cast %114 : vector<1x64x32xbf16> to vector<64x32xbf16>
    %cst_44 = arith.constant dense<0.000000e+00> : vector<8x32xf32>
    %116 = tpu.matmul %113, %115, %cst_44 {dimension_numbers = #tpu.dot_dimension_numbers<[1], [0], [0], [1], [0, 0, 1, 1], [], []>} : vector<8x64xbf16>, vector<64x32xbf16>, vector<8x32xf32> -> vector<8x32xf32>
    %117 = vector.broadcast %10 : vector<1x32xf32> to vector<8x32xf32>
    %118 = arith.addf %116, %117 : vector<8x32xf32>
    %119 = arith.addf %118, %104 : vector<8x32xf32>
    %cst_45 = arith.constant dense<0.000000e+00> : vector<8xf32>
    %120 = vector.multi_reduction <add>, %119, %cst_45 [1] : vector<8x32xf32> to vector<8xf32>
    %121 = vector.shape_cast %120 : vector<8xf32> to vector<8x1xf32>
    %cst_46 = arith.constant 3.200000e+01 : f32
    %122 = vector.broadcast %cst_46 : f32 to vector<8x1xf32>
    %123 = arith.divf %121, %122 : vector<8x1xf32>
    %124 = vector.broadcast %123 : vector<8x1xf32> to vector<8x32xf32>
    %125 = arith.subf %119, %124 : vector<8x32xf32>
    %126 = arith.mulf %125, %125 : vector<8x32xf32>
    %cst_47 = arith.constant dense<0.000000e+00> : vector<8xf32>
    %127 = vector.multi_reduction <add>, %126, %cst_47 [1] : vector<8x32xf32> to vector<8xf32>
    %128 = vector.shape_cast %127 : vector<8xf32> to vector<8x1xf32>
    %cst_48 = arith.constant 3.200000e+01 : f32
    %129 = vector.broadcast %cst_48 : f32 to vector<8x1xf32>
    %130 = arith.divf %128, %129 : vector<8x1xf32>
    %cst_49 = arith.constant 9.99999974E-6 : f32
    %131 = vector.broadcast %cst_49 : f32 to vector<8x1xf32>
    %132 = arith.addf %130, %131 : vector<8x1xf32>
    %133 = math.rsqrt %132 : vector<8x1xf32>
    %134 = vector.broadcast %133 : vector<8x1xf32> to vector<8x32xf32>
    %135 = arith.mulf %125, %134 : vector<8x32xf32>
    %136 = vector.broadcast %11 : vector<1x32xf32> to vector<8x32xf32>
    %137 = arith.mulf %136, %135 : vector<8x32xf32>
    %138 = vector.broadcast %12 : vector<1x32xf32> to vector<8x32xf32>
    %139 = arith.addf %137, %138 : vector<8x32xf32>
    %140 = vector.shape_cast %139 : vector<8x32xf32> to vector<1x8x32xf32>
    %c0_50 = arith.constant 0 : index
    %c0_51 = arith.constant 0 : index
    %c0_52 = arith.constant 0 : index
    %141 = vector.load %arg8[%c0_50, %c0_51, %c0_52] : memref<1x8x32xf32, #tpu.memory_space<vmem>>, vector<1x8x32xf32>
    tpu.vector_store %arg8[%c0_50, %c0_51, %c0_52], %140 {strides = array<i32>} : memref<1x8x32xf32, #tpu.memory_space<vmem>>, vector<1x8x32xf32>,
    return
  }
  func.func @transform_0(%arg0: i32, %arg1: i32) -> (i32, i32, i32) {
    %c0_i32 = arith.constant 0 : i32
    %c0_i32_0 = arith.constant 0 : i32
    %c0_i32_1 = arith.constant 0 : i32
    return %arg0, %c0_i32, %c0_i32_0 : i32, i32, i32
  }
  func.func @transform_1(%arg0: i32, %arg1: i32) -> (i32, i32, i32) {
    %c0_i32 = arith.constant 0 : i32
    %c0_i32_0 = arith.constant 0 : i32
    %c0_i32_1 = arith.constant 0 : i32
    return %arg1, %c0_i32, %c0_i32_0 : i32, i32, i32
  }
  func.func @transform_2(%arg0: i32, %arg1: i32) -> (i32, i32, i32, i32) {
    %c0_i32 = arith.constant 0 : i32
    %c0_i32_0 = arith.constant 0 : i32
    %c0_i32_1 = arith.constant 0 : i32
    %c0_i32_2 = arith.constant 0 : i32
    return %arg1, %c0_i32, %c0_i32_0, %c0_i32_1 : i32, i32, i32, i32
  }
  func.func @transform_3(%arg0: i32, %arg1: i32) -> (i32, i32, i32) {
    %c0_i32 = arith.constant 0 : i32
    %c0_i32_0 = arith.constant 0 : i32
    %c0_i32_1 = arith.constant 0 : i32
    return %arg1, %c0_i32, %c0_i32_0 : i32, i32, i32
  }
  func.func @transform_4(%arg0: i32, %arg1: i32) -> (i32, i32, i32) {
    %c0_i32 = arith.constant 0 : i32
    %c0_i32_0 = arith.constant 0 : i32
    %c0_i32_1 = arith.constant 0 : i32
    return %arg1, %c0_i32, %c0_i32_0 : i32, i32, i32
  }
  func.func @transform_5(%arg0: i32, %arg1: i32) -> (i32, i32, i32) {
    %c0_i32 = arith.constant 0 : i32
    %c0_i32_0 = arith.constant 0 : i32
    %c0_i32_1 = arith.constant 0 : i32
    return %arg1, %c0_i32, %c0_i32_0 : i32, i32, i32
  }
  func.func @transform_6(%arg0: i32, %arg1: i32) -> (i32, i32, i32) {
    %c0_i32 = arith.constant 0 : i32
    %c0_i32_0 = arith.constant 0 : i32
    %c0_i32_1 = arith.constant 0 : i32
    return %arg0, %c0_i32, %c0_i32_0 : i32, i32, i32
  }
}

</mosaic_0001>

<bundles_post_ra>
// kernel: tpu_custom_call.1
= control target key start
LH: loop header
LB: loop body
LE: loop exit
PB: predicated region body
PF: predicated region fallthrough
CT: control target
= control target key end

     0   :  { %s2294_s0 = inlined_call_operand.hbm [shape: f32[2,8,32], index: 0, kind: input, shape index: {}]   ;;  %s2295_s1 = inlined_call_operand.vmem [shape: bf16[2,32,96], index: 1, kind: input, shape index: {}]   ;;  %s2296_s2 = inlined_call_operand.vmem [shape: bf16[2,4,8,32], index: 2, kind: input, shape index: {}]   ;;  %s2297_s3 = inlined_call_operand.vmem [shape: bf16[2,32,64], index: 3, kind: input, shape index: {}]   ;;  %s2298_s4 = inlined_call_operand.vmem [shape: bf16[2,64,32], index: 4, kind: input, shape index: {}]   ;;  %s2299_s5 = inlined_call_operand.vmem [shape: f32[2,8,96], index: 5, kind: input, shape index: {}]   ;;  %s2300_s6 = inlined_call_operand.hbm [shape: f32[2,8,32], index: 6, kind: output, shape index: {}]  }
   0x1   :  { %2309 = sst [smem:[#allocation17_spill]] %s2294_s0 }
   0x2   :  { %11 = vsyncpa [#allocation3], 0 }
   0x3   :  { %13 = vsyncpa [#allocation3 + $0x1], 0 }
   0x4   :  { %14 = vsyncpa [#allocation4], 0 }
   0x5   :  { %16 = vsyncpa [#allocation4 + $0x1], 0  ;;  %s1931_s21 = smov 0   ;;  %s1933_s22 = smov 0  }
   0x6   :  { %s1935_s23 = smov 0   ;;  %s1937_s24 = smov 0  }
   0x7   :  { %s1939_s25 = smov 0   ;;  %s1941_s26 = smov 0  }
   0x8   :  { %s1943_s27 = smov 0   ;;  %s1945_s28 = smov 0  }
   0x9 LB: > { %2310 = sst [smem:[#allocation8_spill]] %s1857_s21  ;;  %s1456_s29 = sadd.s32 4294967295, %s1885_s28   ;;  %s1885_s28 = sphi %s1945_s28, %s22_s28   ;;  %s1881_s27 = sphi %s1943_s27, %s2337_s27   ;;  %s1877_s26 = sphi %s1941_s26, %s2336_s26   ;;  %s1873_s25 = sphi %s1939_s25, %s2335_s25   ;;  %s1869_s24 = sphi %s1937_s24, %s2334_s24   ;;  %s1865_s23 = sphi %s1935_s23, %s2333_s23   ;;  %s1861_s22 = sphi %s1933_s22, %s2332_s22   ;;  %s1857_s21 = sphi %s1931_s21, %s2331_s21  }
   0xa   : > { %2311 = sst [smem:[#allocation9_spill]] %s1861_s22  ;;  %s1457_s30 = sadd.s32 4294967294, %s1885_s28  }
   0xb   : > { %2312 = sst [smem:[#allocation10_spill]] %s1865_s23  ;;  %s31_s7 = sadd.s32 1, %s1877_s26 }
   0xc   : > { %2313 = sst [smem:[#allocation11_spill]] %s1877_s26  ;;  %s34_s8 = sadd.s32 1, %s1881_s27 }
   0xd   : > { %2314 = sst [smem:[#allocation12_spill]] %s1881_s27  ;;  %p32_p0 = scmp.ge.s32.totalorder %s31_s7, 2 }
   0xe   : > { %s41_s9 = sadd.s32 1, %s1865_s23  ;;  %p48_p1 = scmp.ne.s32.totalorder %s1865_s23, %s1861_s22 }
   0xf   : > { %p49_p2 = scmp.eq.s32.totalorder %s1885_s28, 0  ;;  %s2339_s7 = smov (%p32_p0, %s31_s7), 0 }
  0x10   : > { %2315 = sst [smem:[#allocation13_spill]] %s2339_s7  ;;  %s2341_s8 = smov (!%p32_p0, %s34_s8), %s1881_s27 }
  0x11   : > { %p1982_p3 = por %p49_p2, %p48_p1  ;;  %p54_p4 = scmp.ne.s32.totalorder %s1861_s22, %s1857_s21 }
  0x12   : > { %p36_p5 = scmp.ge.s32.totalorder %s2341_s8, 2  ;;  %p55_p6 = scmp.eq.s32.totalorder %s1456_s29, 0 }
  0x13   : > { %p208_p7 = scmp.eq.s32.totalorder %s1456_s29, 3  ;;  %p214_p8 = scmp.eq.s32.totalorder %s1457_s30, 3 }
  0x14   : > { %s2343_s8 = smov (%p36_p5, %s2341_s8), 0  ;;  %p1990_p9 = por %p55_p6, %p54_p4 }
  0x15   : > { %2317 = sst [smem:[#allocation14_spill]] %s2343_s8  ;;  %p1994_p10 = por %p208_p7, %p48_p1 }
  0x16   : > { %s38_s13 = ssub.s32 %s1881_s27, %s2343_s8  ;;  %p2000_p11 = por %p214_p8, %p54_p4 }
  0x17   : > { %s2319_s12 = scalar_select %p1994_p10, 1, 0 }
  0x18   : > { %s2320_s14 = scalar_select %p2000_p11, 1, 0 }
  0x19   : > { %p39_p12 = scmp.eq.s32.totalorder %s38_s13, 0  ;;  %p1656_p13 = scmp.lt.s32.totalorder %s1885_s28, 4 }
  0x1a   : > { %2321 = sst [smem:[#allocation15_spill]] %s2320_s14  ;;  %s234_s15 = sand.u32 1, %s1865_s23  }
  0x1b   : > { %s2007_s16 = scalar_select %p39_p12, %s1865_s23, %s41_s9  }
  0x1c   : > { %s1460_s17 = sshll.u32 %s234_s15, 3  ;;  %s1461_s18 = sshll.u32 %s1881_s27, 7 }
  0x1d   : > { %2322 = sst [smem:[#allocation16_spill]] %s2007_s16  ;;  %s2323_s0 = sld [smem:[#allocation17_spill]] }
  0x1e   : > { %s238_s30 = scalar_lea.vmem [#allocation2], %s1460_s17  ;;  %p2019_p0 = pnand %p1656_p13, %p1982_p3 }
  0x1f   : > { %s245_s8 = sshll.u32 %s238_s30, 4  ;;  %s235_s9 = scalar_lea.sflag [#allocation3], %s234_s15  ;;  %s2015_s8 = int_to_ptr.vmem [resolvable:$true] %s245_s8 }
  0x20   : > { %p1759_p5 = pneg %p2019_p0 }
  0x23   : > { %s2013_s29 = scalar_lea.hbm %s2323_s0, %s1461_s18  ;;  %s1762_s10 = scalar_lea.hbm %s2323_s0, 256 }
  0x24   : > { %s1757_s18 = scalar_lea.hbm %s2013_s29, 128  ;;  %p1763_p3 = scmp.lt.u32.totalorder %s2013_s29, %s2323_s0 }
  0x25   : > { %p1758_p4 = scmp.ne.s32.totalorder %s2013_s29, %s1757_s18  ;;  %p1764_p8 = scmp.lt.u32.totalorder %s1762_s10, %s1757_s18 }
  0x26   : > { %p1766_p13 = scmp.lt.u32.totalorder %s1757_s18, %s2013_s29 }
  0x27   : > { %p1760_p6 = pnand %p1759_p5, %p1758_p4  ;;  %p1765_p12 = por %p1764_p8, %p1763_p3 }
  0x29   : > { %p1761_p7 = pneg %p1760_p6  ;;  %p1767_p1 = por %p1766_p13, %p1765_p12 }
  0x2b   : > { %p1768_p2 = pnand %p1767_p1, %p1761_p7 }
  0x2d   : > { %1771 = shalt.err (!%p1768_p2)
}
  0x2e   : > { %s1772_s15 = scalar_lea.vmem %s2015_s8, 128  ;;  %s1887_s17 = smov [#allocation2]  }
  0x2f   : > { %p1773_p4 = scmp.ne.s32.totalorder %s2015_s8, %s1772_s15  ;;  %s1777_s19 = sshll.u32 %s1887_s17, 4  ;;  %s1778_s19 = int_to_ptr.vmem [resolvable:$false] %s1777_s19 }
  0x30   : > { %s1779_s20 = scalar_lea.vmem %s1778_s19, 256  ;;  %p1780_p10 = scmp.lt.s32.totalorder %s2015_s8, %s1778_s19 }
  0x31   : > { %p1775_p6 = pnand %p1773_p4, %p1759_p5  ;;  %p1781_p3 = scmp.lt.s32.totalorder %s1779_s20, %s1772_s15 }
  0x33   : > { %p1776_p11 = pneg %p1775_p6  ;;  %p1782_p8 = por %p1781_p3, %p1780_p10 }
  0x35   : > { %p1783_p12 = pnand %p1782_p8, %p1776_p11 }
  0x37   : > { %1786 = shalt.err (!%p1783_p12)
}
  0x38   : > { %1651 = dma.hbm_to_vmem [thread:$0]  (!%p2019_p0), %s2013_s29, 128, %s2015_s8, %s235_s9  }
  0x39   : > { %p2325_p1 = scmp.lt.s32.totalorder %s1885_s28, 5  ;;  %p2326_p2 = scmp.ge.s32.totalorder %s1885_s28, 1 }
  0x3b   : > { %p290_p5 = pnand %p2326_p2, %p2325_p1 }
  0x3c   : > { %s2055_s18 = sand.u32 (!%p290_p5), 1, %s1861_s22  }
  0x3d   : > { %293 = sbr.rel (%p290_p5) target bundleno = 2588 (0xa1c), region = 44  ;;  %s1463_s10 = sshll.u32 (!%p290_p5), %s2055_s18, 3 }
  0x3e   : > { %s296_s30 = scalar_lea.sflag (!%p290_p5), [#allocation3], %s2055_s18  ;;  %s299_s15 = scalar_lea.vmem (!%p290_p5), [#allocation2], %s1463_s10 }
  0x44   : > { %1848 = dma.done.wait (%p1990_p9), %s296_s30, 128  }
  0x45   : > { %1850 = vsyncadd (%p1990_p9), %s296_s30, 4294967168  ;;  %p352_p10 = scmp.lt.s32.totalorder %s1869_s24, 1  ;;  %s2086_s17 = scalar_lea.vmem [#allocation5], %s1463_s10 }
  0x46   : > { %p1474_p9 = scmp.ne.s32.totalorder %s1869_s24, 0 }
  0x47   : > { %s353_s8 = scalar_select %p352_p10, %s1869_s24, 1 }
  0x48   : > { %380 = sbr.rel (%p1474_p9) target bundleno = 79 (0x4f), region = 52  ;;  %v381_v0 = vld [vmem:[%s299_s15] sm:$0xff] (!%p1474_p9)  ;;  %vm382_vm0 = vcmask (!%p1474_p9), 261120  }
  0x49   : > { %s1505_s29 = sshll.u32 %s353_s8, 4  ;;  %s1508_s13 = sshll.u32 %s353_s8, 5  ;;  %383 = vst.msk [vmem:[%s2086_s17] sm:$0xff] (!%p1474_p9), %vm382_vm0, %v381_v0 }
  0x4a   : > { %s356_s19 = scalar_lea.vmem %s2295_s1, %s1505_s29  ;;  %s2071_s7 = scalar_lea.vmem %s2296_s2, %s1505_s29 }
  0x4b   : > { %s2076_s11 = scalar_lea.vmem %s2297_s3, %s1505_s29  ;;  %s2081_s23 = scalar_lea.vmem %s2298_s4, %s1508_s13 }
  0x4c   : > { %s1473_s22 = sshll.u32 %s353_s8, 3 }
  0x4d   : > { %s375_s9 = scalar_lea.vmem %s2299_s5, %s1473_s22 }
  0x4f PF: > { %v1729_v1 = vld [vmem:[%s356_s19] sm:$0xff]   ;;  %v1888_v2 = vmov 0.0   ;;  %v1730_v3 = vld [vmem:[%s356_s19 + $0x8] sm:$0xff]   ;;  %vm1889_vm1 = vmmov 0   ;;  %vm407_vm2 = vcmask 261120   ;;  %v391_v6 = vlaneseq  ;;  %s1890_s0 = smov 104  }
  0x50   : > { %1544 = vmatprep.subr.bf16.mxu1 %v1888_v2  ;;  %1558 = vmatprep.subr.bf16.mxu0 %v1888_v2  ;;  %v2095_v4 = vld [vmem:[%s2086_s17] sm:$0xff]  ;;  %v2109_v9 = vld [vmem:[%s375_s9] sm:$0xff]  ;;  %s1891_s21 = smov 120   ;;  %s1892_s22 = smov 112   ;;  %vm468_vm3 = vcmask 64512   ;;  %vm715_vm4 = vcmask 1043456  }
  0x51   : > { %1545 = vmatpush3.bf16.msra.mxu1 %v1729_v1  ;;  %1548 = vmatprep.mubr.msk.bf16.mxu1 %vm1889_vm1, %v1888_v2  ;;  %v386_v5 = vpack.c.bf16 %v2095_v4, %v2095_v4  ;;  %v2106_v7 = vshrl.u32 %v391_v6, 7  ;;  %s1893_s24 = smov 96   ;;  %s1894_s26 = smov 64   ;;  %vm1232_vm5 = vcmask 523264  }
  0x52   : > { %1546 = vmatprep.subr.bf16.mxu1 %v1888_v2  ;;  %1560 = vmatprep.mubr.msk.bf16.mxu0 %vm1889_vm1, %v1888_v2  ;;  %s1315_s27 = sshll.u32 %s2086_s17, 4  ;;  %s1302_s10 = scalar_lea.sflag [#allocation4], %s2055_s18  ;;  %s2240_s27 = int_to_ptr.vmem [resolvable:$true] %s1315_s27 }
  0x53   : > { %v393_v8 = vsub.s32 0, %v2106_v7  ;;  %s1787_s15 = scalar_lea.vmem %s2240_s27, 128  ;;  %p2327_p0 = scmp.ne.s32.totalorder %s2319_s12, 0 }
  0x54   : > { %p1788_p11 = scmp.ne.s32.totalorder %s2240_s27, %s1787_s15 }
  0x55   : > { %1547 = vmatpush3.bf16.msra.mxu1 %v1730_v3  ;;  %v394_v10 = vrot.slane %v2109_v9, %v393_v8 }
  0x56   : > { %1552 = vmatprep.subr.bf16.mxu1 %v1888_v2  ;;  %p1789_p7 = pnand %p1788_p11, %p2327_p0 }
  0x58   : > { %1549 = vmatmul.mubr.msk.bf16.vlgmr.msra.gmra.mrb[0].mxu1 %vm407_vm2, %v386_v5  ;;  %p1790_p13 = pneg %p1789_p7 }
  0x59   : > { %1554 = vmatprep.mubr.msk.bf16.mxu1 %vm1889_vm1, %v1888_v2 }
 0x12b   : > { %v445_v11 = vpop.f32.mrb[0].mxu1 }
 0x12c   : > { %v446_v12 = vadd.f32 %v445_v11, %v394_v10  ;;  %v1550_v13 = vpop.f32.mrb[1].mxu1 }
 0x12d   : > { %v448_v14 = vpop.f32.mrb[2].mxu1 }
 0x12e   : > { %v1551_v15 = vpop.f32.mrb[3].mxu1  ;;  %458 = vrot.lane.b32.xlu1 %v446_v12, %s1890_s0  ;;  %452 = vrot.lane.b32.xlu0 %v446_v12, %s1891_s21  ;;  %v2112_v16 = vpack.c.bf16 %v446_v12, %v446_v12 }
 0x132   : > { %455 = vrot.lane.b32.xlu0 %v446_v12, %s1892_s22  ;;  %466 = vrot.lane.b32.xlu1 %v2112_v16, %s1893_s24 }
 0x1a0   : > { %v459_v17 = vpop.permute.xlu1 %458  ;;  %v453_v18 = vpop.permute.xlu0 %452 }
 0x1a1   : > { %v462_v19 = vpack.c.bf16 %v453_v18, %v453_v18  ;;  %v2115_v22 = vpack.c.bf16 %v459_v17, %v459_v17 }
 0x1a3   : > { %516 = vrot.lane.b32.xlu0 %v462_v19, %s1893_s24 }
 0x1a4   : > { %v456_v20 = vpop.permute.xlu0 %455  ;;  %v467_v21 = vpop.permute.xlu1 %466 }
 0x1a5   : > { %v2117_v23 = vpack.c.bf16 %v456_v20, %v456_v20  ;;  %v473_v24 = vsel %vm468_vm3, %v467_v21, 0 }
 0x1a6   : > { %1553 = vmatpush3.bf16.xpose.msra.mxu1 %v473_v24 }
 0x1a7   : > { %614 = vrot.lane.b32.xlu0 %v2115_v22, %s1893_s24  ;;  %565 = vrot.lane.b32.xlu1 %v2117_v23, %s1893_s24 }
 0x1a8   : > { %1564 = vmatprep.subr.bf16.mxu1 %v1888_v2 }
 0x1ad   : > { %1555 = vmatmul.mubr.msk.bf16.vlgmr.msra.gmra.mrb[4].mxu1 %vm468_vm3, %v2112_v16 }
 0x1ae   : > { %1566 = vmatprep.mubr.msk.bf16.mxu1 %vm1889_vm1, %v1888_v2 }
 0x215   : > { %v517_v25 = vpop.permute.xlu0 %516 }
 0x216   : > { %v522_v26 = vsel %vm468_vm3, %v517_v25, 0 }
 0x217   : > { %1559 = vmatpush3.bf16.xpose.msra.mxu0 %v522_v26 }
 0x218   : > { %1570 = vmatprep.subr.bf16.mxu0 %v1888_v2 }
 0x219   : > { %v566_v27 = vpop.permute.xlu1 %565  ;;  %v615_v29 = vpop.permute.xlu0 %614 }
 0x21a   : > { %v571_v28 = vsel %vm468_vm3, %v566_v27, 0  ;;  %v620_v30 = vsel %vm468_vm3, %v615_v29, 0  ;;  %v1486_v29 = vld [vmem:[%s2071_s7 + $0x4] sm:$0xf] }
 0x21b   : > { %1565 = vmatpush3.bf16.xpose.msra.mxu1 %v571_v28 }
 0x21c   : > { %1576 = vmatprep.subr.bf16.mxu1 %v1888_v2 }
 0x21e   : > { %1561 = vmatmul.mubr.msk.bf16.vlgmr.msra.gmra.mrb[0].mxu0 %vm468_vm3, %v462_v19 }
 0x21f   : > { %1571 = vmatpush3.bf16.xpose.msra.mxu0 %v620_v30  ;;  %1572 = vmatprep.mubr.msk.bf16.mxu0 %vm1889_vm1, %v1888_v2 }
 0x220   : > { %1582 = vmatprep.subr.bf16.mxu0 %v1888_v2 }
 0x222   : > { %1567 = vmatmul.mubr.msk.bf16.vlgmr.msra.gmra.mrb[8].mxu1 %vm468_vm3, %v2117_v23 }
 0x223   : > { %1578 = vmatprep.mubr.msk.bf16.mxu1 %vm1889_vm1, %v1888_v2 }
 0x226   : > { %1573 = vmatmul.mubr.msk.bf16.vlgmr.msra.gmra.mrb[4].mxu0 %vm468_vm3, %v2115_v22 }
 0x227   : > { %1584 = vmatprep.mubr.msk.bf16.mxu0 %vm1889_vm1, %v1888_v2 }
 0x280   : > { %v509_v31 = vpop.f32.mrb[4].mxu1 }
 0x281   : > { %v1556_v32 = vpop.f32.mrb[5].mxu1  ;;  %v662_v33 = vsel %vm468_vm3, %v509_v31, -inf }
 0x282   : > { %663 = vmax.xlane.f32.xlu1 %v662_v33  ;;  %v512_v34 = vpop.f32.mrb[6].mxu1  ;;  %v914_v33 = vsel %vm715_vm4, %v1486_v29, 0 }
 0x283   : > { %v1557_v35 = vpop.f32.mrb[7].mxu1 }
 0x284   : > { %v907_v35 = vld [vmem:[%s2071_s7] sm:$0xf] }
 0x2f1   : > { %v558_v36 = vpop.f32.mrb[0].mxu0 }
 0x2f2   : > { %v1562_v37 = vpop.f32.mrb[1].mxu0  ;;  %v665_v38 = vsel %vm468_vm3, %v558_v36, -inf }
 0x2f3   : > { %666 = vmax.xlane.f32.xlu0 %v665_v38  ;;  %v561_v39 = vpop.f32.mrb[2].mxu0  ;;  %v960_v38 = vsel %vm715_vm4, %v907_v35, 0 }
 0x2f4   : > { %v1563_v40 = vpop.f32.mrb[3].mxu0  ;;  %v1491_v39 = vld [vmem:[%s2071_s7 + $0xc] sm:$0xf] }
 0x2f5   : > { %v607_v41 = vpop.f32.mrb[8].mxu1 }
 0x2f6   : > { %v1568_v42 = vpop.f32.mrb[9].mxu1  ;;  %v668_v43 = vsel %vm468_vm3, %v607_v41, -inf }
 0x2f7   : > { %669 = vmax.xlane.f32.xlu0 %v668_v43  ;;  %v610_v44 = vpop.f32.mrb[10].mxu1  ;;  %v1057_v43 = vsel %vm715_vm4, %v1491_v39, 0  ;;  %v1127_v39 = vsub.s32 3, %v2106_v7 }
 0x2f8   : > { %v1569_v45 = vpop.f32.mrb[11].mxu1 }
 0x2f9   : > { %v656_v46 = vpop.f32.mrb[4].mxu0 }
 0x2fa   : > { %v1574_v47 = vpop.f32.mrb[5].mxu0  ;;  %v671_v48 = vsel %vm468_vm3, %v656_v46, -inf }
 0x2fb   : > { %v659_v49 = vpop.f32.mrb[6].mxu0  ;;  %672 = vmax.xlane.f32.xlu1 %v671_v48 }
 0x2fc   : > { %v1575_v50 = vpop.f32.mrb[7].mxu0 }
 0x30c   : > { %759 = vrot.lane.b32.xlu1 %v462_v19, %s1894_s26 }
 0x30d   : > { %710 = vrot.lane.b32.xlu0 %v2112_v16, %s1894_s26 }
 0x30f   : > { %v664_v51 = vpop.xlane.xlu1 %663 }
 0x310   : > { %v674_v52 = vsub.f32 %v509_v31, %v664_v51 }
 0x312   : > { %v678_v53 = vmul.f32 1.442695, %v674_v52 }
 0x314   : > { %1737 = vpow2.f32 %v678_v53 }
 0x31e   : > { %v1738_v54 = vpop.eup %1737 }
 0x31f   : > { %v686_v55 = vsel %vm468_vm3, %v1738_v54, 0.0 }
 0x32c   : > { %687 = vadd.xlane.f32.xlu0 %v686_v55 }
 0x380   : > { %v667_v56 = vpop.xlane.xlu0 %666 }
 0x381   : > { %v675_v57 = vsub.f32 %v558_v36, %v667_v56 }
 0x383   : > { %v680_v58 = vmul.f32 1.442695, %v675_v57 }
 0x384   : > { %v670_v59 = vpop.xlane.xlu0 %669 }
 0x385   : > { %1739 = vpow2.f32 %v680_v58  ;;  %v676_v60 = vsub.f32 %v607_v41, %v670_v59 }
 0x387   : > { %v682_v61 = vmul.f32 1.442695, %v676_v60 }
 0x388   : > { %v711_v62 = vpop.permute.xlu0 %710  ;;  %v673_v63 = vpop.xlane.xlu1 %672 }
 0x389   : > { %1741 = vpow2.f32 %v682_v61  ;;  %v717_v0 = vsel %vm715_vm4, %v711_v62, 0  ;;  %v677_v1 = vsub.f32 %v656_v46, %v673_v63  ;;  %v1489_v46 = vld [vmem:[%s2071_s7 + $0x8] sm:$0xf] }
 0x38a   : > { %1577 = vmatpush3.bf16.msra.mxu1 %v717_v0  ;;  %v1008_v50 = vsel %vm715_vm4, %v1489_v46, 0 }
 0x38b   : > { %v684_v3 = vmul.f32 1.442695, %v677_v1  ;;  %1588 = vmatprep.subr.bf16.mxu1 %v1888_v2 }
 0x38c   : > { %v760_v5 = vpop.permute.xlu1 %759 }
 0x38d   : > { %1743 = vpow2.f32 %v684_v3  ;;  %v765_v6 = vsel %vm715_vm4, %v760_v5, 0 }
 0x38e   : > { %1583 = vmatpush3.bf16.msra.mxu0 %v765_v6 }
 0x38f   : > { %v1740_v8 = vpop.eup %1739  ;;  %1594 = vmatprep.subr.bf16.mxu0 %v1888_v2 }
 0x390   : > { %v689_v10 = vsel %vm468_vm3, %v1740_v8, 0.0 }
 0x391   : > { %690 = vadd.xlane.f32.xlu1 %v689_v10 }
 0x393   : > { %v1742_v11 = vpop.eup %1741 }
 0x394   : > { %v692_v12 = vsel %vm468_vm3, %v1742_v11, 0.0 }
 0x395   : > { %693 = vadd.xlane.f32.xlu0 %v692_v12  ;;  %v1102_v12 = vsub.s32 1, %v2106_v7 }
 0x397   : > { %v1744_v13 = vpop.eup %1743 }
 0x398   : > { %v695_v14 = vsel %vm468_vm3, %v1744_v13, 0.0 }
 0x399   : > { %696 = vadd.xlane.f32.xlu1 %v695_v14 }
 0x3aa   : > { %807 = vrot.lane.b32.xlu1 %v2117_v23, %s1894_s26 }
 0x3ab   : > { %855 = vrot.lane.b32.xlu0 %v2115_v22, %s1894_s26 }
 0x3b9   : > { %v688_v15 = vpop.xlane.xlu0 %687 }
 0x3ba   : > { %1745 = vrcp.f32 %v688_v15 }
 0x3c4   : > { %v1746_v16 = vpop.eup %1745 }
 0x3c5   : > { %v702_v17 = vmul.f32 %v1746_v16, %v1738_v54  ;;  %v1103_v16 = vrot.slane %v2109_v9, %v1102_v12 }
 0x3c7   : > { %v706_v18 = vpack.c.bf16 %v702_v17, %v702_v17 }
 0x3c9   : > { %1579 = vmatmul.mubr.msk.bf16.vlgmr.msra.gmra.mrb[12].mxu1 %vm468_vm3, %v706_v18 }
 0x3ca   : > { %1590 = vmatprep.mubr.msk.bf16.mxu1 %vm1889_vm1, %v1888_v2 }
 0x41e   : > { %v691_v19 = vpop.xlane.xlu1 %690 }
 0x41f   : > { %1747 = vrcp.f32 %v691_v19 }
 0x422   : > { %v694_v20 = vpop.xlane.xlu0 %693 }
 0x423   : > { %1749 = vrcp.f32 %v694_v20 }
 0x426   : > { %v697_v21 = vpop.xlane.xlu1 %696  ;;  %v856_v25 = vpop.permute.xlu0 %855 }
 0x427   : > { %1751 = vrcp.f32 %v697_v21  ;;  %v861_v31 = vsel %vm715_vm4, %v856_v25, 0 }
 0x429   : > { %v1748_v23 = vpop.eup %1747 }
 0x42a   : > { %v703_v24 = vmul.f32 %v1748_v23, %v1740_v8  ;;  %v808_v22 = vpop.permute.xlu1 %807 }
 0x42b   : > { %v813_v26 = vsel %vm715_vm4, %v808_v22, 0 }
 0x42c   : > { %1589 = vmatpush3.bf16.msra.mxu1 %v813_v26  ;;  %v707_v27 = vpack.c.bf16 %v703_v24, %v703_v24 }
 0x42d   : > { %v1750_v28 = vpop.eup %1749  ;;  %1600 = vmatprep.subr.bf16.mxu1 %v1888_v2 }
 0x42e   : > { %v704_v30 = vmul.f32 %v1750_v28, %v1742_v11  ;;  %1585 = vmatmul.mubr.msk.bf16.vlgmr.msra.gmra.mrb[8].mxu0 %vm468_vm3, %v707_v27 }
 0x42f   : > { %1595 = vmatpush3.bf16.msra.mxu0 %v861_v31  ;;  %1596 = vmatprep.mubr.msk.bf16.mxu0 %vm1889_vm1, %v1888_v2 }
 0x430   : > { %v708_v32 = vpack.c.bf16 %v704_v30, %v704_v30  ;;  %1606 = vmatprep.subr.bf16.mxu0 %v1888_v2 }
 0x431   : > { %v1752_v34 = vpop.eup %1751 }
 0x432   : > { %v705_v36 = vmul.f32 %v1752_v34, %v1744_v13  ;;  %1591 = vmatmul.mubr.msk.bf16.vlgmr.msra.gmra.mrb[16].mxu1 %vm468_vm3, %v708_v32  ;;  %v1731_v32 = vld [vmem:[%s2076_s11] sm:$0xff]  }
 0x433   : > { %1601 = vmatpush3.bf16.msra.mxu1 %v914_v33  ;;  %1602 = vmatprep.mubr.msk.bf16.mxu1 %vm1889_vm1, %v1888_v2  ;;  %v1732_v33 = vld [vmem:[%s2076_s11 + $0x8] sm:$0xff]   ;;  %v1733_v34 = vld [vmem:[%s2081_s23] sm:$0xff]  }
 0x434   : > { %v709_v37 = vpack.c.bf16 %v705_v36, %v705_v36  ;;  %1612 = vmatprep.subr.bf16.mxu1 %v1888_v2 }
 0x436   : > { %1597 = vmatmul.mubr.msk.bf16.vlgmr.msra.gmra.mrb[12].mxu0 %vm468_vm3, %v709_v37 }
 0x437   : > { %1607 = vmatpush3.bf16.msra.mxu0 %v960_v38  ;;  %1608 = vmatprep.mubr.msk.bf16.mxu0 %vm1889_vm1, %v1888_v2  ;;  %v1122_v38 = vsub.s32 2, %v2106_v7 }
 0x438   : > { %1618 = vmatprep.subr.bf16.mxu0 %v1888_v2 }
 0x49c   : > { %v753_v40 = vpop.f32.mrb[12].mxu1 }
 0x49d   : > { %v903_v41 = vpack.c.bf16 %v753_v40, %v753_v40  ;;  %v1580_v42 = vpop.f32.mrb[13].mxu1  ;;  %v1123_v40 = vrot.slane %v2109_v9, %v1122_v38 }
 0x49e   : > { %v756_v44 = vpop.f32.mrb[14].mxu1 }
 0x49f   : > { %v1581_v45 = vpop.f32.mrb[15].mxu1  ;;  %1609 = vmatmul.mubr.msk.bf16.vlgmr.msra.gmra.mrb[16].mxu0 %vm468_vm3, %v903_v41 }
 0x4a0   : > { %1619 = vmatpush3.bf16.msra.mxu0 %v1057_v43  ;;  %1620 = vmatprep.mubr.msk.bf16.mxu0 %vm1889_vm1, %v1888_v2  ;;  %v1128_v43 = vrot.slane %v2109_v9, %v1127_v39 }
 0x4a1   : > { %1632 = vmatprep.subr.bf16.mxu0 %v1888_v2 }
 0x501   : > { %v801_v47 = vpop.f32.mrb[8].mxu0 }
 0x502   : > { %v904_v48 = vpack.c.bf16 %v801_v47, %v801_v47  ;;  %v1586_v49 = vpop.f32.mrb[9].mxu0  ;;  %v1735_v47 = vld [vmem:[%s2081_s23 + $0x10] sm:$0xff]  }
 0x503   : > { %v804_v51 = vpop.f32.mrb[10].mxu0  ;;  %v1137_v49 = vsub.s32 4, %v2106_v7 }
 0x504   : > { %v1587_v52 = vpop.f32.mrb[11].mxu0  ;;  %1603 = vmatmul.mubr.msk.bf16.vlgmr.msra.gmra.mrb[20].mxu1 %vm468_vm3, %v904_v48  ;;  %v1736_v48 = vld [vmem:[%s2081_s23 + $0x18] sm:$0xff]  }
 0x505   : > { %1613 = vmatpush3.bf16.msra.mxu1 %v1008_v50  ;;  %v849_v53 = vpop.f32.mrb[16].mxu1  ;;  %1614 = vmatprep.mubr.msk.bf16.mxu1 %vm1889_vm1, %v1888_v2  ;;  %v1138_v50 = vrot.slane %v2109_v9, %v1137_v49 }
 0x506   : > { %v1592_v54 = vpop.f32.mrb[17].mxu1  ;;  %1624 = vmatprep.subr.bf16.mxu1 %v1888_v2  ;;  %v905_v58 = vpack.c.bf16 %v849_v53, %v849_v53 }
 0x507   : > { %v852_v55 = vpop.f32.mrb[18].mxu1 }
 0x508   : > { %v1593_v56 = vpop.f32.mrb[19].mxu1 }
 0x509   : > { %v897_v57 = vpop.f32.mrb[12].mxu0 }
 0x50a   : > { %v906_v59 = vpack.c.bf16 %v897_v57, %v897_v57  ;;  %v1598_v60 = vpop.f32.mrb[13].mxu0 }
 0x50b   : > { %v900_v61 = vpop.f32.mrb[14].mxu0 }
 0x50c   : > { %v1599_v62 = vpop.f32.mrb[15].mxu0  ;;  %1615 = vmatmul.mubr.msk.bf16.vlgmr.msra.gmra.mrb[24].mxu1 %vm468_vm3, %v905_v58  ;;  %1621 = vmatmul.mubr.msk.bf16.vlgmr.msra.gmra.mrb[20].mxu0 %vm468_vm3, %v906_v59  ;;  %v1206_v58 = vsub.s32 5, %v2106_v7 }
 0x50d   : > { %1628 = vmatprep.mubr.msk.bf16.mxu1 %vm1889_vm1, %v1888_v2  ;;  %1640 = vmatprep.mubr.msk.bf16.mxu0 %vm1889_vm1, %v1888_v2 }
 0x50e   : > { %1625 = vmatpush3.bf16.msra.mxu1 %v1731_v32  ;;  %1633 = vmatpush3.bf16.msra.mxu0 %v1733_v34  ;;  %v1207_v59 = vrot.slane %v2109_v9, %v1206_v58 }
 0x50f   : > { %1626 = vmatprep.subr.bf16.mxu1 %v1888_v2  ;;  %1634 = vmatprep.subr.bf16.mxu0 %v1888_v2 }
 0x512   : > { %1627 = vmatpush3.bf16.msra.mxu1 %v1732_v33 }
 0x572   : > { %v996_v63 = vpop.f32.mrb[16].mxu0 }
 0x573   : > { %v1610_v0 = vpop.f32.mrb[17].mxu0 }
 0x574   : > { %v999_v1 = vpop.f32.mrb[18].mxu0 }
 0x575   : > { %v1611_v3 = vpop.f32.mrb[19].mxu0 }
 0x5d7   : > { %v950_v5 = vpop.f32.mrb[20].mxu1 }
 0x5d8   : > { %v997_v6 = vadd.f32 %v996_v63, %v950_v5  ;;  %v1604_v8 = vpop.f32.mrb[21].mxu1 }
 0x5d9   : > { %v953_v10 = vpop.f32.mrb[22].mxu1 }
 0x5da   : > { %v1605_v11 = vpop.f32.mrb[23].mxu1 }
 0x5df   : > { %v1044_v13 = vpop.f32.mrb[24].mxu1  ;;  %v1093_v14 = vpop.f32.mrb[20].mxu0 }
 0x5e0   : > { %v1050_v15 = vadd.f32 %v1044_v13, %v997_v6  ;;  %v1616_v17 = vpop.f32.mrb[25].mxu1  ;;  %v1622_v18 = vpop.f32.mrb[21].mxu0 }
 0x5e1   : > { %v1047_v19 = vpop.f32.mrb[26].mxu1  ;;  %v1096_v20 = vpop.f32.mrb[22].mxu0 }
 0x5e2   : > { %v1099_v21 = vadd.f32 %v1093_v14, %v1050_v15  ;;  %v1617_v23 = vpop.f32.mrb[27].mxu1  ;;  %v1623_v24 = vpop.f32.mrb[23].mxu0  ;;  %v1292_v14 = vsub.s32 6, %v2106_v7  ;;  %v1297_v15 = vsub.s32 7, %v2106_v7 }
 0x5e4   : > { %v1104_v22 = vadd.f32 %v1103_v16, %v1099_v21  ;;  %v1293_v16 = vrot.slane %v2109_v9, %v1292_v14  ;;  %v1298_v19 = vrot.slane %v2109_v9, %v1297_v15 }
 0x5e6   : > { %v1105_v25 = vadd.f32 %v1104_v22, %v2095_v4  ;;  %v1734_v4 = vld [vmem:[%s2081_s23 + $0x8] sm:$0xff]   ;;  %s1502_s23 = sshll.u32 %s1873_s25, 7  ;;  %s1895_s25 = smov [#allocation5]  }
 0x5e7   : > { %1635 = vmatpush3.bf16.msra.mxu0 %v1734_v4  ;;  %s2238_s16 = scalar_lea.hbm %s2300_s6, %s1502_s23  ;;  %s1791_s8 = sshll.u32 %s1895_s25, 4  ;;  %s1792_s8 = int_to_ptr.vmem [resolvable:$false] %s1791_s8 }
 0x5e8   : > { %v1106_v26 = vsel %vm407_vm2, %v1105_v25, 0.0  ;;  %1636 = vmatprep.subr.bf16.mxu0 %v1888_v2  ;;  %s1793_s29 = scalar_lea.vmem %s1792_s8, 256  ;;  %p1794_p4 = scmp.lt.s32.totalorder %s2240_s27, %s1792_s8 }
 0x5e9   : > { %1107 = vadd.xlane.f32.xlu1 %v1106_v26  ;;  %p1795_p6 = scmp.lt.s32.totalorder %s1793_s29, %s1787_s15 }
 0x5eb   : > { %1637 = vmatpush3.bf16.msra.mxu0 %v1735_v47  ;;  %p1796_p3 = por %p1795_p6, %p1794_p4 }
 0x5ec   : > { %1638 = vmatprep.subr.bf16.mxu0 %v1888_v2 }
 0x5ed   : > { %p1797_p8 = pnand %p1796_p3, %p1790_p13 }
 0x5ef   : > { %1639 = vmatpush3.bf16.msra.mxu0 %v1736_v48 }
 0x676   : > { %v1108_v27 = vpop.xlane.xlu1 %1107 }
 0x677   : > { %v1110_v28 = vmul.f32 0.03125, %v1108_v27 }
 0x679   : > { %v1111_v29 = vsub.f32 %v1105_v25, %v1110_v28 }
 0x67b   : > { %v1112_v30 = vmul.f32 %v1111_v29, %v1111_v29 }
 0x67d   : > { %v1113_v31 = vsel %vm407_vm2, %v1112_v30, 0.0 }
 0x67e   : > { %1114 = vadd.xlane.f32.xlu0 %v1113_v31 }
 0x70b   : > { %v1115_v35 = vpop.xlane.xlu0 %1114 }
 0x70c   : > { %v1116_v36 = vmul.f32 0.03125, %v1115_v35 }
 0x70e   : > { %v1117_v37 = vadd.f32 1e-05, %v1116_v36 }
 0x710   : > { %1753 = vrsqrt.f32 %v1117_v37 }
 0x71a   : > { %v1754_v41 = vpop.eup %1753 }
 0x71b   : > { %v1119_v42 = vmul.f32 %v1754_v41, %v1111_v29 }
 0x71d   : > { %v1124_v44 = vmul.f32 %v1123_v40, %v1119_v42 }
 0x71f   : > { %v1129_v45 = vadd.f32 %v1128_v43, %v1124_v44 }
 0x721   : > { %v1130_v46 = vpack.c.bf16 %v1129_v45, %v1129_v45 }
 0x723   : > { %1629 = vmatmul.mubr.msk.bf16.vlgmr.msra.gmra.mrb[28].mxu1 %vm407_vm2, %v1130_v46 }
 0x7f6   : > { %v1188_v51 = vpop.f32.mrb[28].mxu1 }
 0x7f7   : > { %v1189_v52 = vadd.f32 %v1188_v51, %v1138_v50  ;;  %v1630_v53 = vpop.f32.mrb[29].mxu1 }
 0x7f8   : > { %v1191_v54 = vpop.f32.mrb[30].mxu1 }
 0x7f9   : > { %v1194_v55 = vmax.f32 %v1189_v52, 0.0  ;;  %v1631_v56 = vpop.f32.mrb[31].mxu1 }
 0x7fb   : > { %v1195_v57 = vpack.c.bf16 %v1194_v55, %v1194_v55 }
 0x7fd   : > { %1641 = vmatmul.mubr.msk.bf16.vlgmr.msra.gmra.mrb[24].mxu0 %vm1232_vm5, %v1195_v57 }
 0x8d0   : > { %v1270_v2 = vpop.f32.mrb[24].mxu0 }
 0x8d1   : > { %v1271_v60 = vadd.f32 %v1270_v2, %v1207_v59  ;;  %v1642_v61 = vpop.f32.mrb[25].mxu0 }
 0x8d2   : > { %v1273_v62 = vpop.f32.mrb[26].mxu0 }
 0x8d3   : > { %v1643_v63 = vpop.f32.mrb[27].mxu0  ;;  %v1276_v0 = vadd.f32 %v1271_v60, %v1129_v45 }
 0x8d5   : > { %v1277_v1 = vsel %vm407_vm2, %v1276_v0, 0.0 }
 0x8d6   : > { %1278 = vadd.xlane.f32.xlu0 %v1277_v1 }
 0x963   : > { %v1279_v3 = vpop.xlane.xlu0 %1278 }
 0x964   : > { %v1280_v5 = vmul.f32 0.03125, %v1279_v3 }
 0x966   : > { %v1281_v6 = vsub.f32 %v1276_v0, %v1280_v5 }
 0x968   : > { %v1282_v8 = vmul.f32 %v1281_v6, %v1281_v6 }
 0x96a   : > { %v1283_v10 = vsel %vm407_vm2, %v1282_v8, 0.0 }
 0x96b   : > { %1284 = vadd.xlane.f32.xlu1 %v1283_v10 }
 0x9f8   : > { %v1285_v11 = vpop.xlane.xlu1 %1284 }
 0x9f9   : > { %v1286_v12 = vmul.f32 0.03125, %v1285_v11 }
 0x9fb   : > { %v1287_v13 = vadd.f32 1e-05, %v1286_v12 }
 0x9fd   : > { %1755 = vrsqrt.f32 %v1287_v13 }
 0xa07   : > { %v1756_v17 = vpop.eup %1755 }
 0xa08   : > { %v1289_v18 = vmul.f32 %v1756_v17, %v1281_v6 }
 0xa0a   : > { %v1294_v20 = vmul.f32 %v1293_v16, %v1289_v18 }
 0xa0c   : > { %v1299_v21 = vadd.f32 %v1298_v19, %v1294_v20 }
 0xa0e   : > { %1300 = vst.msk [vmem:[%s2086_s17] sm:$0xff] %vm407_vm2, %v1299_v21 }
 0xa0f   : > { %1800 = shalt.err (!%p1797_p8)
}
 0xa10   : > { %s1801_s18 = scalar_lea.hbm %s2238_s16, 128  ;;  %s1805_s20 = scalar_lea.hbm %s2300_s6, 256 }
 0xa11   : > { %p1802_p12 = scmp.ne.s32.totalorder %s2238_s16, %s1801_s18  ;;  %p1806_p5 = scmp.lt.u32.totalorder %s2238_s16, %s2300_s6 }
 0xa12   : > { %p1807_p10 = scmp.lt.u32.totalorder %s1805_s20, %s1801_s18  ;;  %p1809_p11 = scmp.lt.u32.totalorder %s1801_s18, %s2238_s16 }
 0xa13   : > { %p1803_p1 = pnand %p1802_p12, %p2327_p0 }
 0xa14   : > { %p1808_p9 = por %p1807_p10, %p1806_p5 }
 0xa15   : > { %p1804_p2 = pneg %p1803_p1 }
 0xa16   : > { %p1810_p7 = por %p1809_p11, %p1808_p9 }
 0xa18   : > { %p1811_p13 = pnand %p1810_p7, %p1804_p2 }
 0xa1a   : > { %1814 = shalt.err (!%p1811_p13)
}
 0xa1b   : > { %1646 = dma.vmem_to_hbm [thread:$0]  (%p2327_p0), %s2240_s27, 128, %s2238_s16, %s1302_s10  }
 0xa1c PF: > { %s2328_s9 = sld [smem:[#allocation8_spill]]  ;;  %s2329_s17 = sld [smem:[#allocation15_spill]] }
 0xa1d   : > { %p1657_p4 = scmp.ge.s32.totalorder %s1885_s28, 2 }
 0xa22   : > { %s1327_s0 = sand.u32 1, %s2328_s9   ;;  %p2330_p6 = scmp.ne.s32.totalorder %s2329_s17, 0 }
 0xa23   : > { %s1328_s21 = scalar_lea.sflag [#allocation4], %s1327_s0 }
 0xa24   : > { %p1653_p3 = pnand %p1657_p4, %p2330_p6 }
 0xa26   : > { %1852 = dma.done.wait (!%p1653_p3), %s1328_s21, 128  }
 0xa27   : > { %1854 = vsyncadd (!%p1653_p3), %s1328_s21, 4294967168  ;;  %s22_s28 = sadd.s32 1, %s1885_s28   ;;  %s2331_s21 = sld [smem:[#allocation9_spill]] }
 0xa28   : > { %p19_p8 = scmp.ge.s32.totalorder %s22_s28, 6   ;;  %s2332_s22 = sld [smem:[#allocation10_spill]] }
 0xa29   : > { %s2333_s23 = sld [smem:[#allocation16_spill]]  ;;  %s2334_s24 = sld [smem:[#allocation11_spill]] }
 0xa2a   : > { %s2335_s25 = sld [smem:[#allocation12_spill]]  ;;  %s2336_s26 = sld [smem:[#allocation13_spill]] }
 0xa2b   : > { %s2337_s27 = sld [smem:[#allocation14_spill]]  ;;  %21 = sbr.rel (!%p19_p8) target bundleno = 9 (0x9), region = 111 }
 0xa32   :  { %1333 = vsyncpa [#allocation3], 1 }
 0xa33   :  { %1335 = vsyncpa [#allocation3 + $0x1], 1 }
 0xa34   :  { %1336 = vsyncpa [#allocation4], 1 }
 0xa35   :  { %1338 = vsyncpa [#allocation4 + $0x1], 1 }

</bundles_post_ra>
